<compile_context>
chip_gen: v7x
topology: tpu7x:2x2x1
jax: 0.10.0
libtpu: 0.0.40
codegen_flags: <defaults>
</compile_context>

<pallas_src>
import functools

import jax
import jax.numpy as jnp
from jax.experimental import pallas as pl
from jax.experimental.pallas import tpu as pltpu

EMBEDDING_SIZE = 2000
MASS_SHIFT = 5
NODE_FEATURES = 50
OUTPUT_SIZE = 1000
EMBEDDING_SIZE_REDUCED = int(EMBEDDING_SIZE * 0.15)  # 300

# lane-dense padded sizes (multiples of 128); pad regions hold zeros
EP = 384          # per-head GAT feature dim (300 -> 384)
IN_PAD = 128      # node feature dim        (50  -> 128)
DP = 2048         # EMBEDDING_SIZE          (2000 -> 2048)
HDP = 1024        # skipblock hidden        (1000 -> 1024)
OUT_PAD = 1024    # OUTPUT_SIZE             (1000 -> 1024)
ROWS_PAD = 8      # graph-batch rows padded to one sublane tile

_VMEM_LIMIT = 48 * 1024 * 1024   # <= v7x 64 MiB physical VMEM, with headroom


# ----------------------------------------------------------------------------
# Kernel 1: tiled Linear (optional ReLU prolog) with bf16 weights, grid over
# dout tiles ("parallel" -> megacore-splittable, weight DMA double-buffered)
# ----------------------------------------------------------------------------
def _linear_kernel(x_ref, w_ref, b_ref, o_ref, *, prolog_relu):
    h = x_ref[...]
    if prolog_relu:
        h = jnp.maximum(h, 0.0)
    o_ref[...] = jnp.dot(h.astype(jnp.bfloat16), w_ref[...],
                         preferred_element_type=jnp.float32) + b_ref[...]


def linear_tiled(x, w, b, prolog_relu=False):
    rows, din = x.shape
    dout = w.shape[1]
    tn = 1024 if dout % 1024 == 0 else (512 if dout % 512 == 0 else 256)
    assert dout % tn == 0, (dout, tn)
    kernel = functools.partial(_linear_kernel, prolog_relu=prolog_relu)
    return pl.pallas_call(
        kernel,
        out_shape=jax.ShapeDtypeStruct((rows, dout), jnp.float32),
        grid=(dout // tn,),
        in_specs=[
            pl.BlockSpec((rows, din), lambda j: (0, 0)),   # activation, resident (f32)
            pl.BlockSpec((din, tn), lambda j: (0, j)),     # weight tile, streamed (bf16)
            pl.BlockSpec((1, tn), lambda j: (0, j)),       # bias tile (f32)
        ],
        out_specs=pl.BlockSpec((rows, tn), lambda j: (0, j)),
        compiler_params=pltpu.CompilerParams(
            dimension_semantics=("parallel",), vmem_limit_bytes=_VMEM_LIMIT),
    )(x, w, b.reshape(1, dout))


# ----------------------------------------------------------------------------
# Kernel 2: fused GATConv — per-head projection (MXU) + dense attention,
# one head per grid step ("parallel" -> one head per TC on v7x)
# ----------------------------------------------------------------------------
def _gat_conv_kernel(x_ref, w_ref, asrc_ref, adst_ref, bias_ref, adjb_ref, o_ref,
                     *, prolog_relu):
    x = x_ref[...]
    if prolog_relu:
        x = jnp.maximum(x, 0.0)
    xl = jnp.dot(x.astype(jnp.bfloat16), w_ref[0],
                 preferred_element_type=jnp.float32)            # (N, EP), pads = 0
    a_src = jnp.sum(xl * asrc_ref[0], axis=-1, keepdims=True)   # (N, 1)
    a_dst = jnp.sum(xl * adst_ref[0], axis=-1, keepdims=True)   # (N, 1)
    logits = a_dst + jnp.transpose(a_src)                       # (N, N): [target, source]
    logits = jnp.where(logits >= 0.0, logits, 0.2 * logits)     # leaky_relu(0.2)
    logits = logits + adjb_ref[...].astype(jnp.float32)         # additive adjacency mask
    logits = logits - jnp.max(logits, axis=-1, keepdims=True)
    p = jnp.exp(logits)                                         # off-edge -> exp(-huge) = 0
    inv = pl.reciprocal(jnp.sum(p, axis=-1, keepdims=True), approx=True)
    alpha = (p * inv).astype(jnp.bfloat16)                      # softmax over sources
    o_ref[...] = jnp.dot(alpha, xl.astype(jnp.bfloat16),
                         preferred_element_type=jnp.float32) + bias_ref[0]


def gat_conv(x, adjbias, p, heads, prolog_relu=False):
    n, din = x.shape
    kernel = functools.partial(_gat_conv_kernel, prolog_relu=prolog_relu)
    return pl.pallas_call(
        kernel,
        out_shape=jax.ShapeDtypeStruct((n, heads * EP), jnp.float32),
        grid=(heads,),
        in_specs=[
            pl.BlockSpec((n, din), lambda h: (0, 0)),        # node features, resident
            pl.BlockSpec((1, din, EP), lambda h: (h, 0, 0)), # per-head projection W (bf16)
            pl.BlockSpec((1, 1, EP), lambda h: (h, 0, 0)),   # att_src[h]
            pl.BlockSpec((1, 1, EP), lambda h: (h, 0, 0)),   # att_dst[h]
            pl.BlockSpec((1, 1, EP), lambda h: (h, 0, 0)),   # bias[h]
            pl.BlockSpec((n, n), lambda h: (0, 0)),          # additive adjacency bias, resident
        ],
        out_specs=pl.BlockSpec((n, EP), lambda h: (0, h)),   # head-blocked output
        compiler_params=pltpu.CompilerParams(
            dimension_semantics=("parallel",), vmem_limit_bytes=_VMEM_LIMIT),
    )(x, p["W"], p["att_src"], p["att_dst"], p["bias_h"], adjbias)


# ----------------------------------------------------------------------------
# Kernel 3: fused chain of 7 SKIPblocks (BN->ReLU->W1, BN->ReLU->W2, +residual)
# grid over layer index; activation accumulates in the resident o_ref while the
# stacked bf16 [7, 2048, 1024] / [7, 1024, 2048] weights stream through.
# ----------------------------------------------------------------------------
def _skipchain_kernel(x_ref, s1_ref, t1_ref, w1_ref, b1_ref,
                      s2_ref, t2_ref, w2_ref, b2_ref, o_ref):
    @pl.when(pl.program_id(0) == 0)
    def _():
        o_ref[...] = x_ref[...]
    act = o_ref[...]
    h = jnp.maximum(act * s1_ref[0] + t1_ref[0], 0.0)
    h = jnp.dot(h.astype(jnp.bfloat16), w1_ref[0],
                preferred_element_type=jnp.float32) + b1_ref[0]
    h = jnp.maximum(h * s2_ref[0] + t2_ref[0], 0.0)
    h = jnp.dot(h.astype(jnp.bfloat16), w2_ref[0],
                preferred_element_type=jnp.float32) + b2_ref[0]
    o_ref[...] = act + h


def skipchain(x, s1, t1, w1, b1, s2, t2, w2, b2):
    rows = x.shape[0]
    n_layers = w1.shape[0]
    return pl.pallas_call(
        _skipchain_kernel,
        out_shape=jax.ShapeDtypeStruct((rows, DP), jnp.float32),
        grid=(n_layers,),
        in_specs=[
            pl.BlockSpec((rows, DP), lambda l: (0, 0)),      # input activation, resident
            pl.BlockSpec((1, 1, DP), lambda l: (l, 0, 0)),   # bn1 scale
            pl.BlockSpec((1, 1, DP), lambda l: (l, 0, 0)),   # bn1 shift
            pl.BlockSpec((1, DP, HDP), lambda l: (l, 0, 0)), # W1 (bf16, streamed)
            pl.BlockSpec((1, 1, HDP), lambda l: (l, 0, 0)),  # b1
            pl.BlockSpec((1, 1, HDP), lambda l: (l, 0, 0)),  # bn2 scale
            pl.BlockSpec((1, 1, HDP), lambda l: (l, 0, 0)),  # bn2 shift
            pl.BlockSpec((1, HDP, DP), lambda l: (l, 0, 0)), # W2 (bf16, streamed)
            pl.BlockSpec((1, 1, DP), lambda l: (l, 0, 0)),   # b2
        ],
        out_specs=pl.BlockSpec((rows, DP), lambda l: (0, 0)),  # resident accumulator
        compiler_params=pltpu.CompilerParams(
            dimension_semantics=("arbitrary",), vmem_limit_bytes=_VMEM_LIMIT),
    )(x, s1, t1, w1, b1, s2, t2, w2, b2)


# ----------------------------------------------------------------------------
# Module glue (layout plumbing + tiny tail ops in plain XLA, heavy compute in
# the Pallas kernels above)
# ----------------------------------------------------------------------------
def forward(params, x, edge_index, edge_weight, total_mass, batch_index, *, heads, num_graphs):
    del edge_weight  # GATConv without edge_dim ignores edge_attr
    n = x.shape[0]
    # dense adjacency adj[target, source] with self loops -> additive attention
    # mask: 0 on edge / self loop, -1e30 elsewhere, stored bf16 and shared by all heads
    adj = jnp.zeros((n, n), jnp.float32)
    adj = adj.at[edge_index[1], edge_index[0]].set(1.0)
    adj = adj.at[jnp.arange(n), jnp.arange(n)].set(1.0)
    adjbias = jnp.where(adj > 0.0, 0.0, -1e30).astype(jnp.bfloat16)

    x_p = jnp.pad(x, ((0, 0), (0, IN_PAD - NODE_FEATURES)))

    h = gat_conv(x_p, adjbias, params["initial_conv"], heads)
    for i in range(1, 5):
        p = params[f"skipgat{i}"]
        g = gat_conv(h, adjbias, p["conv1"], heads, prolog_relu=True)   # relu1 fused
        g = gat_conv(g, adjbias, p["conv2"], heads, prolog_relu=True)   # relu2 fused
        h = g + h                                                       # residual (tiny)
    hm = gat_conv(h, adjbias, params["mean_conv"], heads)               # concat=False head avg
    hm = hm.reshape(n, heads, EP).mean(axis=1)                          # bias added per head

    # global max pool per graph (tiny XLA glue)
    onehot = batch_index[None, :] == jnp.arange(num_graphs)[:, None]
    pooled = jnp.max(jnp.where(onehot[:, :, None], hm[None, :, :], -jnp.inf), axis=1)
    rows_pad = max(ROWS_PAD, ((num_graphs + 7) // 8) * 8)
    pooled = jnp.pad(pooled, ((0, rows_pad - num_graphs), (0, 0)))      # (rows_pad, EP)

    h = linear_tiled(pooled, params["bottleneck"]["W"], params["bottleneck"]["b"])

    # 7 skipblocks fused into one pipelined call (BN eval folded to affine scale/shift)
    eps = 1e-5
    sk = params["skipchain"]
    s1 = sk["bn1_gamma"] / jnp.sqrt(sk["bn1_var"] + eps)
    t1 = sk["bn1_beta"] - sk["bn1_mean"] * s1
    s2 = sk["bn2_gamma"] / jnp.sqrt(sk["bn2_var"] + eps)
    t2 = sk["bn2_beta"] - sk["bn2_mean"] * s2
    h = skipchain(h, s1[:, None, :], t1[:, None, :], sk["W1"], sk["b1"][:, None, :],
                  s2[:, None, :], t2[:, None, :], sk["W2"], sk["b2"][:, None, :])

    # forward / backward / gate heads fused into one tiled matmul; relu_out_resnet is prolog
    ph = params["out_heads"]
    heads_out = linear_tiled(h, ph["W"], ph["b"], prolog_relu=True)[:num_graphs]
    fwd_p = heads_out[:, 0:OUT_PAD]
    bwd_p = heads_out[:, OUT_PAD:2 * OUT_PAD]
    gate_p = heads_out[:, 2 * OUT_PAD:3 * OUT_PAD]

    # tail (mass mask, reverse gather, gate mix, ReLU) in plain XLA: B x 1024
    # elementwise + a data-dependent lane gather — launch cost of a kernel > math
    mass_i = jnp.round(total_mass).astype(jnp.int32)[:, None]           # (B, 1)
    col = jnp.arange(OUT_PAD, dtype=jnp.int32)[None, :]
    fwd_m = jnp.where(col > mass_i + MASS_SHIFT, 0.0, fwd_p)            # mask_prediction_by_mass
    idx = mass_i + MASS_SHIFT - col                                     # reverse_prediction
    valid = (idx >= 0) & (idx < OUTPUT_SIZE)
    rev_p = jnp.where(
        valid, jnp.take_along_axis(bwd_p, jnp.clip(idx, 0, OUT_PAD - 1), axis=1), 0.0)
    gate = jax.nn.sigmoid(gate_p)
    out = jnp.maximum(gate * fwd_m + (1.0 - gate) * rev_p, 0.0)
    # TODO(synk): final .type(torch.float64) cast omitted; TPU compute kept in float32.
    return out[:, :OUTPUT_SIZE]


# ----------------------------------------------------------------------------
# Deterministic parameter init (logical shapes follow GAT_DEEP_BIG.__init__,
# placed into zero-padded, lane-dense / head-stacked layouts; streamed weights bf16)
# ----------------------------------------------------------------------------
def init_params(key, heads):
    e = EMBEDDING_SIZE_REDUCED                 # 300 per head
    hp_log = heads * e                         # logical concat width
    keys = iter(jax.random.split(key, 256))

    def nrm(shape, fan_in):
        return jax.random.normal(next(keys), shape, jnp.float32) / jnp.sqrt(float(fan_in))

    def place_mat(dst_shape, src, row_blocks, col_blocks):
        out = jnp.zeros(dst_shape, jnp.float32)
        for rd, rs, rn in row_blocks:
            for cd, cs, cn in col_blocks:
                out = out.at[rd:rd + rn, cd:cd + cn].set(src[rs:rs + rn, cs:cs + cn])
        return out

    def place_vec(dst_len, src, blocks):
        out = jnp.zeros((dst_len,), jnp.float32)
        for d, s, ln in blocks:
            out = out.at[d:d + ln].set(src[s:s + ln])
        return out

    head_blocks = [(hh * EP, hh * e, e) for hh in range(heads)]   # head-blocked input layout
    full = lambda ln: [(0, 0, ln)]

    def gat(in_log, in_pad, in_blocks, concat):
        w_log = nrm((in_log, heads * e), in_log)                  # lin (bias=False)
        w = jnp.stack([
            place_mat((in_pad, EP), w_log[:, hh * e:(hh + 1) * e], in_blocks, full(e))
            for hh in range(heads)]).astype(jnp.bfloat16)         # (heads, in_pad, EP)
        att_src = jnp.zeros((heads, 1, EP), jnp.float32).at[:, :, :e].set(nrm((heads, 1, e), e))
        att_dst = jnp.zeros((heads, 1, EP), jnp.float32).at[:, :, :e].set(nrm((heads, 1, e), e))
        if concat:
            b_log = nrm((heads * e,), e)
            bias_h = jnp.stack([place_vec(EP, b_log[hh * e:(hh + 1) * e], full(e))
                                for hh in range(heads)])[:, None, :]      # (heads, 1, EP)
        else:
            b_pad = place_vec(EP, nrm((e,), e), full(e))
            bias_h = jnp.tile(b_pad[None, None, :], (heads, 1, 1))  # mean(o_h + b) = mean + b
        return dict(W=w, att_src=att_src, att_dst=att_dst, bias_h=bias_h)

    def skipgat():
        return dict(conv1=gat(hp_log, heads * EP, head_blocks, True),
                    conv2=gat(hp_log, heads * EP, head_blocks, True))

    # bottleneck Linear(300 -> 2000)
    bottleneck = dict(
        W=place_mat((EP, DP), nrm((e, EMBEDDING_SIZE), e),
                    full(e), full(EMBEDDING_SIZE)).astype(jnp.bfloat16),
        b=place_vec(DP, nrm((EMBEDDING_SIZE,), e), full(EMBEDDING_SIZE)))

    # 7 SKIPblocks, weights stacked [L, ...] for the fused chain kernel
    hd = int(EMBEDDING_SIZE * 0.5)             # 1000
    n_layers = 7
    W1s, b1s, W2s, b2s = [], [], [], []
    for _ in range(n_layers):
        # weight_norm(dim=0): w[o, i] = g[o] * v[o, i] / ||v[o, :]||, g taken as 1 here
        v1 = nrm((hd, EMBEDDING_SIZE), EMBEDDING_SIZE)
        w1 = (v1 / jnp.linalg.norm(v1, axis=1, keepdims=True)).T          # (2000, 1000)
        v2 = nrm((EMBEDDING_SIZE, hd), hd)
        w2 = (v2 / jnp.linalg.norm(v2, axis=1, keepdims=True)).T          # (1000, 2000)
        W1s.append(place_mat((DP, HDP), w1, full(EMBEDDING_SIZE), full(hd)))
        b1s.append(place_vec(HDP, nrm((hd,), EMBEDDING_SIZE), full(hd)))
        W2s.append(place_mat((HDP, DP), w2, full(hd), full(EMBEDDING_SIZE)))
        b2s.append(place_vec(DP, nrm((EMBEDDING_SIZE,), hd), full(EMBEDDING_SIZE)))
    skipchain_p = dict(
        W1=jnp.stack(W1s).astype(jnp.bfloat16), b1=jnp.stack(b1s),
        W2=jnp.stack(W2s).astype(jnp.bfloat16), b2=jnp.stack(b2s),
        # BatchNorm1d eval: gamma=1, beta=0, running mean=0, running var=1
        bn1_gamma=jnp.ones((n_layers, DP), jnp.float32),
        bn1_beta=jnp.zeros((n_layers, DP), jnp.float32),
        bn1_mean=jnp.zeros((n_layers, DP), jnp.float32),
        bn1_var=jnp.ones((n_layers, DP), jnp.float32),
        bn2_gamma=jnp.ones((n_layers, HDP), jnp.float32),
        bn2_beta=jnp.zeros((n_layers, HDP), jnp.float32),
        bn2_mean=jnp.zeros((n_layers, HDP), jnp.float32),
        bn2_var=jnp.ones((n_layers, HDP), jnp.float32))

    # forward / backward / gate heads, fused along the output dim
    def head_lin():
        w = place_mat((DP, OUT_PAD), nrm((EMBEDDING_SIZE, OUTPUT_SIZE), EMBEDDING_SIZE),
                      full(EMBEDDING_SIZE), full(OUTPUT_SIZE))
        b = place_vec(OUT_PAD, nrm((OUTPUT_SIZE,), EMBEDDING_SIZE), full(OUTPUT_SIZE))
        return w, b
    wf, bf = head_lin(); wb, bb = head_lin(); wg, bg = head_lin()
    out_heads = dict(W=jnp.concatenate([wf, wb, wg], axis=1).astype(jnp.bfloat16),
                     b=jnp.concatenate([bf, bb, bg], axis=0))

    params = dict(
        initial_conv=gat(NODE_FEATURES, IN_PAD, full(NODE_FEATURES), True),
        mean_conv=gat(hp_log, heads * EP, head_blocks, False),
        bottleneck=bottleneck,
        skipchain=skipchain_p,
        out_heads=out_heads,
    )
    for i in range(1, 5):
        params[f"skipgat{i}"] = skipgat()
    return params


# ----------------------------------------------------------------------------
if __name__ == "__main__":
    key = jax.random.PRNGKey(0)
    kx, ke, kp = jax.random.split(key, 3)

    heads = 2
    num_graphs = 2
    nodes_per_graph = 8
    n_nodes = num_graphs * nodes_per_graph

    x = jax.random.normal(kx, (n_nodes, NODE_FEATURES), jnp.float32)

    # bidirectional ring inside each graph
    src, dst = [], []
    for g in range(num_graphs):
        base = g * nodes_per_graph
        for i in range(nodes_per_graph):
            a = base + i
            b = base + (i + 1) % nodes_per_graph
            src += [a, b]
            dst += [b, a]
    edge_index = jnp.array([src, dst], dtype=jnp.int32)
    edge_weight = jax.random.uniform(ke, (edge_index.shape[1],), jnp.float32)  # unused
    total_mass = jnp.array([412.3, 587.8], jnp.float32)
    batch_index = jnp.repeat(jnp.arange(num_graphs, dtype=jnp.int32), nodes_per_graph)

    params = init_params(kp, heads)

    out = forward(params, x, edge_index, edge_weight, total_mass, batch_index,
                  heads=heads, num_graphs=num_graphs)
    out = jax.block_until_ready(out)
    assert out.shape == (num_graphs, OUTPUT_SIZE), out.shape
    assert bool(jnp.all(jnp.isfinite(out)))
    print("KERNEL_OK")
</pallas_src>

<mosaic_0001>
module attributes {stable_mosaic.version = 11 : i64} {
  func.func @_gat_conv_kernel(%arg0: i32, %arg1: memref<16x128xf32, #tpu.memory_space<vmem>>, %arg2: memref<1x128x384xbf16, #tpu.memory_space<vmem>>, %arg3: memref<1x1x384xf32, #tpu.memory_space<vmem>>, %arg4: memref<1x1x384xf32, #tpu.memory_space<vmem>>, %arg5: memref<1x1x384xf32, #tpu.memory_space<vmem>>, %arg6: memref<16x16xbf16, #tpu.memory_space<vmem>>, %arg7: memref<16x384xf32, #tpu.memory_space<vmem>>) attributes {dimension_semantics = [#tpu.dimension_semantics<parallel>], iteration_bounds = array<i64: 2>, scalar_prefetch = 0 : i64, scratch_operands = 0 : i64, tpu.core_type = #tpu.core_type<tc>, window_params = [{pipeline_mode = #tpu.pipeline_mode<synchronous>, transform_indices = @transform_0, window_bounds = array<i64: 16, 128>}, {transform_indices = @transform_1, window_bounds = array<i64: 1, 128, 384>}, {transform_indices = @transform_2, window_bounds = array<i64: 1, 1, 384>}, {transform_indices = @transform_3, window_bounds = array<i64: 1, 1, 384>}, {transform_indices = @transform_4, window_bounds = array<i64: 1, 1, 384>}, {pipeline_mode = #tpu.pipeline_mode<synchronous>, transform_indices = @transform_5, window_bounds = array<i64: 16, 16>}, {transform_indices = @transform_6, window_bounds = array<i64: 16, 384>}]} {
    %c0 = arith.constant 0 : index
    %c0_0 = arith.constant 0 : index
    %0 = vector.load %arg1[%c0, %c0_0] : memref<16x128xf32, #tpu.memory_space<vmem>>, vector<16x128xf32>
    %1 = arith.truncf %0 : vector<16x128xf32> to vector<16x128xbf16>
    %c0_1 = arith.constant 0 : index
    %c0_2 = arith.constant 0 : index
    %c0_3 = arith.constant 0 : index
    %2 = vector.load %arg2[%c0_1, %c0_2, %c0_3] : memref<1x128x384xbf16, #tpu.memory_space<vmem>>, vector<1x128x384xbf16>
    %3 = vector.shape_cast %2 : vector<1x128x384xbf16> to vector<128x384xbf16>
    %cst = arith.constant dense<0.000000e+00> : vector<16x384xf32>
    %4 = tpu.matmul %1, %3, %cst {dimension_numbers = #tpu.dot_dimension_numbers<[1], [0], [0], [1], [0, 0, 1, 1], [], []>} : vector<16x128xbf16>, vector<128x384xbf16>, vector<16x384xf32> -> vector<16x384xf32>
    %c0_4 = arith.constant 0 : index
    %c0_5 = arith.constant 0 : index
    %c0_6 = arith.constant 0 : index
    %5 = vector.load %arg3[%c0_4, %c0_5, %c0_6] : memref<1x1x384xf32, #tpu.memory_space<vmem>>, vector<1x1x384xf32>
    %6 = vector.shape_cast %5 : vector<1x1x384xf32> to vector<1x384xf32>
    %7 = vector.broadcast %6 : vector<1x384xf32> to vector<16x384xf32>
    %8 = arith.mulf %4, %7 : vector<16x384xf32>
    %cst_7 = arith.constant dense<0.000000e+00> : vector<16xf32>
    %9 = vector.multi_reduction <add>, %8, %cst_7 [1] : vector<16x384xf32> to vector<16xf32>
    %10 = vector.shape_cast %9 : vector<16xf32> to vector<16x1xf32>
    %c0_8 = arith.constant 0 : index
    %c0_9 = arith.constant 0 : index
    %c0_10 = arith.constant 0 : index
    %11 = vector.load %arg4[%c0_8, %c0_9, %c0_10] : memref<1x1x384xf32, #tpu.memory_space<vmem>>, vector<1x1x384xf32>
    %12 = vector.shape_cast %11 : vector<1x1x384xf32> to vector<1x384xf32>
    %13 = vector.broadcast %12 : vector<1x384xf32> to vector<16x384xf32>
    %14 = arith.mulf %4, %13 : vector<16x384xf32>
    %cst_11 = arith.constant dense<0.000000e+00> : vector<16xf32>
    %15 = vector.multi_reduction <add>, %14, %cst_11 [1] : vector<16x384xf32> to vector<16xf32>
    %16 = vector.shape_cast %15 : vector<16xf32> to vector<16x1xf32>
    %17 = tpu.transpose %10, [1, 0] : vector<16x1xf32> -> vector<1x16xf32>
    %18 = vector.broadcast %16 : vector<16x1xf32> to vector<16x16xf32>
    %19 = vector.broadcast %17 : vector<1x16xf32> to vector<16x16xf32>
    %20 = arith.addf %18, %19 : vector<16x16xf32>
    %cst_12 = arith.constant 0.000000e+00 : f32
    %21 = vector.broadcast %cst_12 : f32 to vector<16x16xf32>
    %22 = arith.cmpf oge, %20, %21 : vector<16x16xf32>
    %cst_13 = arith.constant 2.000000e-01 : f32
    %23 = vector.broadcast %cst_13 : f32 to vector<16x16xf32>
    %24 = arith.mulf %23, %20 : vector<16x16xf32>
    %25 = arith.select %22, %20, %24 : vector<16x16xi1>, vector<16x16xf32>
    %c0_14 = arith.constant 0 : index
    %c0_15 = arith.constant 0 : index
    %26 = vector.load %arg6[%c0_14, %c0_15] : memref<16x16xbf16, #tpu.memory_space<vmem>>, vector<16x16xbf16>
    %27 = arith.extf %26 : vector<16x16xbf16> to vector<16x16xf32>
    %28 = arith.addf %25, %27 : vector<16x16xf32>
    %cst_16 = arith.constant dense<0xFF800000> : vector<16xf32>
    %29 = vector.multi_reduction <maximumf>, %28, %cst_16 [1] : vector<16x16xf32> to vector<16xf32>
    %30 = vector.shape_cast %29 : vector<16xf32> to vector<16x1xf32>
    %31 = vector.broadcast %30 : vector<16x1xf32> to vector<16x16xf32>
    %32 = arith.subf %28, %31 : vector<16x16xf32>
    %33 = math.exp %32 : vector<16x16xf32>
    %cst_17 = arith.constant dense<0.000000e+00> : vector<16xf32>
    %34 = vector.multi_reduction <add>, %33, %cst_17 [1] : vector<16x16xf32> to vector<16xf32>
    %35 = vector.shape_cast %34 : vector<16xf32> to vector<16x1xf32>
    %36 = tpu.reciprocal %35 {approx = true} : vector<16x1xf32> -> vector<16x1xf32>
    %37 = vector.broadcast %36 : vector<16x1xf32> to vector<16x16xf32>
    %38 = arith.mulf %33, %37 : vector<16x16xf32>
    %39 = arith.truncf %38 : vector<16x16xf32> to vector<16x16xbf16>
    %40 = arith.truncf %4 : vector<16x384xf32> to vector<16x384xbf16>
    %cst_18 = arith.constant dense<0.000000e+00> : vector<16x384xf32>
    %41 = tpu.matmul %39, %40, %cst_18 {dimension_numbers = #tpu.dot_dimension_numbers<[1], [0], [0], [1], [0, 0, 1, 1], [], []>} : vector<16x16xbf16>, vector<16x384xbf16>, vector<16x384xf32> -> vector<16x384xf32>
    %c0_19 = arith.constant 0 : index
    %c0_20 = arith.constant 0 : index
    %c0_21 = arith.constant 0 : index
    %42 = vector.load %arg5[%c0_19, %c0_20, %c0_21] : memref<1x1x384xf32, #tpu.memory_space<vmem>>, vector<1x1x384xf32>
    %43 = vector.shape_cast %42 : vector<1x1x384xf32> to vector<1x384xf32>
    %44 = vector.broadcast %43 : vector<1x384xf32> to vector<16x384xf32>
    %45 = arith.addf %41, %44 : vector<16x384xf32>
    %c0_22 = arith.constant 0 : index
    %c0_23 = arith.constant 0 : index
    %46 = vector.load %arg7[%c0_22, %c0_23] : memref<16x384xf32, #tpu.memory_space<vmem>>, vector<16x384xf32>
    tpu.vector_store %arg7[%c0_22, %c0_23], %45 {strides = array<i32>} : memref<16x384xf32, #tpu.memory_space<vmem>>, vector<16x384xf32>,
    return
  }
  func.func @transform_0(%arg0: i32) -> (i32, i32) {
    %c0_i32 = arith.constant 0 : i32
    %c0_i32_0 = arith.constant 0 : i32
    %c0_i32_1 = arith.constant 0 : i32
    return %c0_i32, %c0_i32_0 : i32, i32
  }
  func.func @transform_1(%arg0: i32) -> (i32, i32, i32) {
    %c0_i32 = arith.constant 0 : i32
    %c0_i32_0 = arith.constant 0 : i32
    %c0_i32_1 = arith.constant 0 : i32
    return %arg0, %c0_i32, %c0_i32_0 : i32, i32, i32
  }
  func.func @transform_2(%arg0: i32) -> (i32, i32, i32) {
    %c0_i32 = arith.constant 0 : i32
    %c0_i32_0 = arith.constant 0 : i32
    %c0_i32_1 = arith.constant 0 : i32
    return %arg0, %c0_i32, %c0_i32_0 : i32, i32, i32
  }
  func.func @transform_3(%arg0: i32) -> (i32, i32, i32) {
    %c0_i32 = arith.constant 0 : i32
    %c0_i32_0 = arith.constant 0 : i32
    %c0_i32_1 = arith.constant 0 : i32
    return %arg0, %c0_i32, %c0_i32_0 : i32, i32, i32
  }
  func.func @transform_4(%arg0: i32) -> (i32, i32, i32) {
    %c0_i32 = arith.constant 0 : i32
    %c0_i32_0 = arith.constant 0 : i32
    %c0_i32_1 = arith.constant 0 : i32
    return %arg0, %c0_i32, %c0_i32_0 : i32, i32, i32
  }
  func.func @transform_5(%arg0: i32) -> (i32, i32) {
    %c0_i32 = arith.constant 0 : i32
    %c0_i32_0 = arith.constant 0 : i32
    %c0_i32_1 = arith.constant 0 : i32
    return %c0_i32, %c0_i32_0 : i32, i32
  }
  func.func @transform_6(%arg0: i32) -> (i32, i32) {
    %c0_i32 = arith.constant 0 : i32
    %c0_i32_0 = arith.constant 0 : i32
    return %c0_i32, %arg0 : i32, i32
  }
}

</mosaic_0001>

<bundles_post_ra>
// kernel: tpu_custom_call.1
= control target key start
LH: loop header
LB: loop body
LE: loop exit
PB: predicated region body
PF: predicated region fallthrough
CT: control target
= control target key end

     0   :  { %s1835_s0 = inlined_call_operand.hbm [shape: f32[16,128], index: 0, kind: input, shape index: {}]   ;;  %s1836_s1 = inlined_call_operand.hbm [shape: bf16[2,128,384], index: 1, kind: input, shape index: {}]   ;;  %s1837_s2 = inlined_call_operand.vmem [shape: f32[2,1,384], index: 2, kind: input, shape index: {}]   ;;  %s1838_s3 = inlined_call_operand.hbm [shape: f32[2,1,384], index: 3, kind: input, shape index: {}]   ;;  %s1839_s4 = inlined_call_operand.hbm [shape: f32[2,1,384], index: 4, kind: input, shape index: {}]   ;;  %s1840_s5 = inlined_call_operand.vmem [shape: bf16[16,16], index: 5, kind: input, shape index: {}]   ;;  %s1841_s6 = inlined_call_operand.hbm [shape: f32[16,768], index: 6, kind: output, shape index: {}]  }
   0x1   :  { %1857 = sst [smem:[#allocation19_spill]] %s1836_s1 }
   0x2   :  { %11 = vsyncpa [#allocation3], 0 }
   0x3   :  { %12 = vsyncpa [#allocation6], 0 }
   0x4   :  { %14 = vsyncpa [#allocation6 + $0x1], 0 }
   0x5   :  { %15 = vsyncpa [#allocation9], 0 }
   0x6   :  { %17 = vsyncpa [#allocation9 + $0x1], 0 }
   0x7   :  { %18 = vsyncpa [#allocation4], 0 }
   0x8   :  { %20 = vsyncpa [#allocation4 + $0x1], 0  ;;  %s1478_s21 = smov 0   ;;  %s1480_s22 = smov 0  }
   0x9   :  { %s1482_s23 = smov 0   ;;  %s1484_s24 = smov 0  }
   0xa LB: > { %1858 = sst [smem:[#allocation15_spill]] %s1422_s23  ;;  %s1499_s25 = sadd.s32 1, %s1426_s24   ;;  %s1426_s24 = sphi %s1484_s24, %s1884_s24   ;;  %s1422_s23 = sphi %s1482_s23, %s1886_s23   ;;  %s1418_s22 = sphi %s1480_s22, %s1888_s22   ;;  %s1414_s21 = sphi %s1478_s21, %s1887_s21  }
   0xb   : > { %1859 = sst [smem:[#allocation16_spill]] %s1499_s25  ;;  %s54_s26 = sadd.s32 1, %s1422_s23 }
   0xc   : > { %s51_s27 = ssub.s32 %s1426_s24, %s1499_s25  ;;  %p1842_p0 = scmp.ne.s32.totalorder %s1422_s23, %s1418_s22 }
   0xd   : > { %p52_p1 = scmp.eq.s32.totalorder %s51_s27, 0  ;;  %p62_p2 = scmp.eq.s32.totalorder %s1426_s24, 0 }
   0xe   : > { %p1148_p4 = scmp.lt.s32.totalorder %s1426_s24, 2  ;;  %s232_s29 = sand.u32 1, %s1426_s24  }
   0xf   : > { %s1510_s28 = scalar_select %p52_p1, %s1422_s23, %s54_s26  }
  0x10   : > { %p63_p5 = por %p62_p2, %p1842_p0  ;;  %s1517_s30 = sand.u32 1, %s1422_s23  }
  0x11   : > { %1860 = sst [smem:[#allocation17_spill]] %s1510_s28  ;;  %s1107_s7 = smul.u32 192, %s1517_s30 }
  0x12   : > { %p1520_p6 = pnand %p1148_p4, %p63_p5  ;;  %s1108_s9 = smul.u32 3072, %s1426_s24 }
  0x13   : > { %s1862_s1 = sld [smem:[#allocation19_spill]]  ;;  %s236_s13 = scalar_lea.vmem [#allocation5], %s1107_s7 }
  0x14   : > { %s1861_s8 = scalar_select %p1520_p6, 1, 0 }
  0x15   : > { %s243_s14 = sshll.u32 %s236_s13, 4  ;;  %s1532_s15 = scalar_lea.sflag [#allocation6], %s232_s29  ;;  %s1530_s14 = int_to_ptr.vmem [resolvable:$true] %s243_s14 }
  0x16   : > { %p1538_p8 = pneg %p1520_p6 }
  0x18   : > { %s1863_s17 = scalar_select %p1538_p8, 1, 0 }
  0x19   : > { %s1528_s12 = scalar_lea.hbm %s1862_s1, %s1108_s9  ;;  %s1239_s20 = scalar_lea.hbm %s1862_s1, 6144 }
  0x1a   : > { %s1234_s16 = scalar_lea.hbm %s1528_s12, 3072  ;;  %p1240_p11 = scmp.lt.u32.totalorder %s1528_s12, %s1862_s1 }
  0x1b   : > { %p1235_p7 = scmp.ne.s32.totalorder %s1528_s12, %s1234_s16  ;;  %p1241_p12 = scmp.lt.u32.totalorder %s1239_s20, %s1234_s16 }
  0x1c   : > { %p1243_p1 = scmp.lt.u32.totalorder %s1234_s16, %s1528_s12 }
  0x1d   : > { %p1237_p9 = pnand %p1538_p8, %p1235_p7  ;;  %p1242_p13 = por %p1241_p12, %p1240_p11 }
  0x1f   : > { %p1238_p10 = pneg %p1237_p9  ;;  %p1244_p2 = por %p1243_p1, %p1242_p13 }
  0x21   : > { %p1245_p4 = pnand %p1244_p2, %p1238_p10 }
  0x23   : > { %1248 = shalt.err (!%p1245_p4)
}
  0x24   : > { %s1249_s29 = scalar_lea.vmem %s1530_s14, 3072  ;;  %s1428_s7 = smov [#allocation5]  }
  0x25   : > { %p1250_p5 = scmp.ne.s32.totalorder %s1530_s14, %s1249_s29  ;;  %s1254_s9 = sshll.u32 %s1428_s7, 4  ;;  %s1255_s9 = int_to_ptr.vmem [resolvable:$false] %s1254_s9 }
  0x26   : > { %s1256_s10 = scalar_lea.vmem %s1255_s9, 6144  ;;  %p1257_p3 = scmp.lt.s32.totalorder %s1530_s14, %s1255_s9 }
  0x27   : > { %p1252_p7 = pnand %p1250_p5, %p1538_p8  ;;  %p1258_p0 = scmp.lt.s32.totalorder %s1256_s10, %s1249_s29 }
  0x29   : > { %p1253_p9 = pneg %p1252_p7  ;;  %p1259_p11 = por %p1258_p0, %p1257_p3 }
  0x2b   : > { %p1260_p12 = pnand %p1259_p11, %p1253_p9 }
  0x2d   : > { %1263 = shalt.err (!%p1260_p12)
}
  0x2e   : > { %s1429_s11 = smov 192   ;;  %s1430_s13 = smov 12  }
  0x2f   : > { %1136 = dma.hbm_to_vmem [thread:$0]  (!%p1520_p6), %s1528_s12, 3072, %s1530_s14, %s1532_s15, %s1429_s11, %s1429_s11, %s1430_s13  }
  0x30   : > { %s1563_s16 = sadd.s32 4294967295, %s1426_s24   ;;  %s1027_s18 = sadd.s32 4294967294, %s1426_s24  }
  0x31   : > { %p67_p0 = scmp.ne.s32.totalorder %s1418_s22, %s1414_s21  ;;  %p1847_p3 = scmp.eq.s32.totalorder %s1563_s16, 0 }
  0x32   : > { %p190_p10 = scmp.eq.s32.totalorder %s1563_s16, 1  ;;  %p196_p13 = scmp.eq.s32.totalorder %s1027_s18, 1 }
  0x33   : > { %p1572_p1 = por %p1847_p3, %p67_p0  ;;  %p1028_p2 = scmp.ge.s32.totalorder %s1426_s24, 1 }
  0x34   : > { %p1865_p4 = scmp.ne.s32.totalorder %s1422_s23, %s1418_s22  ;;  %p1584_p7 = por %p196_p13, %p67_p0 }
  0x35   : > { %s1864_s19 = scalar_select %p1572_p1, 1, 0 }
  0x36   : > { %p1580_p5 = por %p190_p10, %p1865_p4  ;;  %p203_p9 = scmp.lt.s32.totalorder %s1426_s24, 3 }
  0x37   : > { %s1867_s14 = scalar_select %p1584_p7, 1, 0 }
  0x38   : > { %s1866_s12 = scalar_select %p1580_p5, 1, 0 }
  0x39   : > { %1868 = sst [smem:[#allocation18_spill]] %s1867_s14  ;;  %p1589_p11 = pnand %p1028_p2, %p203_p9 }
  0x3a   : > { %s1431_s26 = smov [#allocation2]   ;;  %s1855_s29 = smul.u32 3, %s1517_s30 }
  0x3b   : > { %s1869_s20 = scalar_select %p1589_p11, 1, 0 }
  0x3c   : > { %s215_s27 = sshll.u32 %s1431_s26, 4  ;;  %p1129_p12 = pneg %p1589_p11  ;;  %s1593_s27 = int_to_ptr.vmem [resolvable:$true] %s215_s27 }
  0x3d   : > { %s1856_s7 = smul.u32 48, %s1426_s24  ;;  %s264_s18 = scalar_lea.vmem [#allocation7], %s1855_s29 }
  0x3e   : > { %p1601_p10 = pnand %p1129_p12, %p1847_p3  ;;  %s272_s26 = sshll.u32 %s264_s18, 4  ;;  %s1614_s26 = int_to_ptr.vmem [resolvable:$true] %s272_s26 }
  0x3f   : > { %s1610_s13 = scalar_lea.hbm %s1838_s3, %s1856_s7  ;;  %s1264_s23 = scalar_lea.hbm %s1835_s0, 256 }
  0x40   : > { %p1265_p0 = scmp.ne.s32.totalorder %s1835_s0, %s1264_s23  ;;  %p1266_p13 = pneg %p1601_p10 }
  0x41   : > { %p1271_p9 = scmp.lt.u32.totalorder %s1264_s23, %s1835_s0 }
  0x42   : > { %p1267_p2 = pnand %p1266_p13, %p1265_p0 }
  0x44   : > { %p1268_p4 = pneg %p1267_p2 }
  0x46   : > { %p1273_p12 = pnand %p1271_p9, %p1268_p4 }
  0x48   : > { %1276 = shalt.err (!%p1273_p12)
}
  0x49   : > { %s1277_s18 = scalar_lea.vmem %s1593_s27, 256  ;;  %p1285_p1 = scmp.lt.s32.totalorder %s1593_s27, %s1593_s27 }
  0x4a   : > { %p1278_p3 = scmp.ne.s32.totalorder %s1593_s27, %s1277_s18  ;;  %p1286_p11 = scmp.lt.s32.totalorder %s1277_s18, %s1277_s18 }
  0x4c   : > { %p1280_p7 = pnand %p1278_p3, %p1266_p13  ;;  %p1287_p6 = por %p1286_p11, %p1285_p1 }
  0x4e   : > { %p1281_p5 = pneg %p1280_p7 }
  0x50   : > { %p1288_p8 = pnand %p1287_p6, %p1281_p5 }
  0x52   : > { %1291 = shalt.err (!%p1288_p8)
}
  0x53   : > { %s1432_s1 = smov 128   ;;  %s1433_s23 = smov 8  }
  0x54   : > { %1132 = dma.hbm_to_vmem [thread:$0]  (!%p1601_p10), %s1835_s0, 256, %s1593_s27, [#allocation3], %s1432_s1, %s1432_s1, %s1433_s23  }
  0x55   : > { %s1292_s14 = scalar_lea.hbm %s1610_s13, 48  ;;  %p1871_p7 = scmp.ne.s32.totalorder %s1863_s17, 0 }
  0x56   : > { %p1293_p3 = scmp.ne.s32.totalorder %s1610_s13, %s1292_s14  ;;  %s1297_s18 = scalar_lea.hbm %s1838_s3, 96 }
  0x57   : > { %p1298_p8 = scmp.lt.u32.totalorder %s1610_s13, %s1838_s3  ;;  %p1299_p5 = scmp.lt.u32.totalorder %s1297_s18, %s1292_s14 }
  0x58   : > { %p1295_p1 = pnand %p1293_p3, %p1871_p7  ;;  %p1301_p0 = scmp.lt.u32.totalorder %s1292_s14, %s1610_s13 }
  0x59   : > { %p1300_p11 = por %p1299_p5, %p1298_p8 }
  0x5a   : > { %p1296_p6 = pneg %p1295_p1 }
  0x5b   : > { %p1302_p13 = por %p1301_p0, %p1300_p11 }
  0x5d   : > { %p1303_p2 = pnand %p1302_p13, %p1296_p6 }
  0x5f   : > { %1306 = shalt.err (!%p1303_p2)
}
  0x60   : > { %s1307_s27 = scalar_lea.vmem %s1614_s26, 48  ;;  %s1434_s9 = smov [#allocation7]  }
  0x61   : > { %p1308_p10 = scmp.ne.s32.totalorder %s1614_s26, %s1307_s27  ;;  %s1312_s1 = sshll.u32 %s1434_s9, 4  ;;  %s1313_s1 = int_to_ptr.vmem [resolvable:$false] %s1312_s1 }
  0x62   : > { %s1314_s29 = scalar_lea.vmem %s1313_s1, 96  ;;  %p1315_p12 = scmp.lt.s32.totalorder %s1614_s26, %s1313_s1 }
  0x63   : > { %p1310_p4 = pnand %p1308_p10, %p1871_p7  ;;  %p1316_p3 = scmp.lt.s32.totalorder %s1314_s29, %s1307_s27 }
  0x65   : > { %p1311_p9 = pneg %p1310_p4  ;;  %p1317_p1 = por %p1316_p3, %p1315_p12 }
  0x67   : > { %p1318_p8 = pnand %p1317_p1, %p1311_p9 }
  0x69   : > { %1321 = shalt.err (!%p1318_p8)
}
  0x6a   : > { %p1872_p6 = scmp.ne.s32.totalorder %s1861_s8, 0  ;;  %s1873_s7 = smul.u32 48, %s1426_s24 }
  0x6b   : > { %s1874_s14 = smul.u32 3, %s1517_s30  ;;  %s280_s18 = scalar_lea.sflag [#allocation9], %s1517_s30 }
  0x6c   : > { %1139 = dma.hbm_to_vmem [thread:$0]  (!%p1872_p6), %s1610_s13, 48, %s1614_s26, %s1532_s15  }
  0x6d   : > { %s1664_s28 = scalar_lea.hbm %s1839_s4, %s1873_s7  ;;  %s283_s10 = scalar_lea.vmem [#allocation8], %s1874_s14 }
  0x6e   : > { %s291_s11 = sshll.u32 %s283_s10, 4  ;;  %s1322_s27 = scalar_lea.hbm %s1664_s28, 48  ;;  %s292_s11 = int_to_ptr.vmem [resolvable:$true] %s291_s11 }
  0x6f   : > { %p1323_p5 = scmp.ne.s32.totalorder %s1664_s28, %s1322_s27  ;;  %s1327_s26 = scalar_lea.hbm %s1839_s4, 96 }
  0x70   : > { %p1328_p13 = scmp.lt.u32.totalorder %s1664_s28, %s1839_s4  ;;  %p1329_p2 = scmp.lt.u32.totalorder %s1327_s26, %s1322_s27 }
  0x71   : > { %p1325_p11 = pnand %p1323_p5, %p1871_p7  ;;  %p1331_p4 = scmp.lt.u32.totalorder %s1322_s27, %s1664_s28 }
  0x72   : > { %p1330_p10 = por %p1329_p2, %p1328_p13 }
  0x73   : > { %p1326_p0 = pneg %p1325_p11 }
  0x74   : > { %p1332_p9 = por %p1331_p4, %p1330_p10 }
  0x76   : > { %p1333_p12 = pnand %p1332_p9, %p1326_p0 }
  0x78   : > { %1336 = shalt.err (!%p1333_p12)
}
  0x79   : > { %s1337_s30 = scalar_lea.vmem %s292_s11, 48  ;;  %s1435_s29 = smov [#allocation8]  }
  0x7a   : > { %p1338_p3 = scmp.ne.s32.totalorder %s292_s11, %s1337_s30  ;;  %s1342_s7 = sshll.u32 %s1435_s29, 4  ;;  %s1343_s7 = int_to_ptr.vmem [resolvable:$false] %s1342_s7 }
  0x7b   : > { %s1344_s23 = scalar_lea.vmem %s1343_s7, 96  ;;  %p1345_p5 = scmp.lt.s32.totalorder %s292_s11, %s1343_s7 }
  0x7c   : > { %p1340_p1 = pnand %p1338_p3, %p1871_p7  ;;  %p1346_p11 = scmp.lt.s32.totalorder %s1344_s23, %s1337_s30 }
  0x7e   : > { %p1341_p8 = pneg %p1340_p1  ;;  %p1347_p6 = por %p1346_p11, %p1345_p5 }
  0x80   : > { %p1348_p2 = pnand %p1347_p6, %p1341_p8 }
  0x82   : > { %1351 = shalt.err (!%p1348_p2)
}
  0x83   : > { %p1875_p13 = scmp.ne.s32.totalorder %s1861_s8, 0  ;;  %p1876_p0 = scmp.ne.s32.totalorder %s1869_s20, 0 }
  0x84   : > { %p1877_p10 = scmp.eq.s32.totalorder (!%p1876_p0), %s1563_s16, 0 }
  0x85   : > { %1142 = dma.hbm_to_vmem [thread:$0]  (!%p1875_p13), %s1664_s28, 48, %s292_s11, %s280_s18  }
  0x86   : > { %300 = sbr.rel (%p1876_p0) target bundleno = 1238 (0x4d6), region = 44 }
  0x8d   : > { %1397 = dma.done.wait (%p1877_p10), [#allocation3], 256   ;;  %p1878_p7 = pmov %p1877_p10 }
  0x8e   : > { %s306_s17 = sand.u32 1, %s1563_s16   ;;  %s1694_s25 = sand.u32 1, %s1418_s22  }
  0x8f   : > { %1399 = vsyncadd (%p1878_p7), [#allocation3], 4294967040  ;;  %s1113_s14 = smul.u32 192, %s1694_s25  ;;  %s307_s8 = scalar_lea.sflag [#allocation6], %s306_s17 }
  0x90   : > { %p1879_p6 = scmp.ne.s32.totalorder %s1864_s19, 0 }
  0x91   : > { %s1697_s10 = scalar_lea.vmem [#allocation5], %s1113_s14 }
  0x92   : > { %1401 = dma.done.wait (%p1879_p6), %s307_s8, 3120  }
  0x93   : > { %1403 = vsyncadd (%p1879_p6), %s307_s8, 4294964176  ;;  %s1114_s20 = smul.u32 3, %s1694_s25  ;;  %s325_s11 = scalar_lea.sflag [#allocation9], %s1694_s25 }
  0x95   : > { %s1704_s28 = scalar_lea.vmem [#allocation7], %s1114_s20  ;;  %s1707_s18 = scalar_lea.vmem [#allocation8], %s1114_s20 }
  0x96   : > { %1405 = dma.done.wait (%p1879_p6), %s325_s11, 48  }
  0x97   : > { %1407 = vsyncadd (%p1879_p6), %s325_s11, 4294967248  ;;  %v1436_v0 = vmov 0.0   ;;  %v1437_v1 = vmov 0   ;;  %vm1438_vm0 = vmmov 0   ;;  %v1194_v2 = vld [vmem:[%s1697_s10 + $0x4] ss:$12 sps:$4 sm:$0xff]   ;;  %v626_v29 = vlaneseq }
  0x98   : > { %1081 = vmatprep.subr.bf16.mxu1 %v1436_v0  ;;  %572 = vmatprep.mubr.bf16.mxu0 %v1437_v1  ;;  %v1196_v3 = vld [vmem:[%s1697_s10] ss:$12 sps:$4 sm:$0xff]   ;;  %v1197_v4 = vld [vmem:[%s1697_s10 + $0x8] ss:$12 sps:$4 sm:$0xff]   ;;  %v1200_v6 = vld [vmem:[%s1697_s10 + $0x18] ss:$12 sps:$4 sm:$0xff]  }
  0x99   : > { %1097 = vmatprep.mubr.msk.bf16.mxu1 %vm1438_vm0, %v1436_v0  ;;  %540 = vmatprep.subr.bf16.mxu0 %v1194_v2  ;;  %v1198_v5 = vld [vmem:[%s1697_s10 + $0x1c] ss:$12 sps:$4 sm:$0xff]   ;;  %v1201_v7 = vld [vmem:[%s1697_s10 + $0x20] ss:$12 sps:$4 sm:$0xff]   ;;  %v1205_v10 = vld [vmem:[%s1697_s10 + $0x38] ss:$12 sps:$4 sm:$0xff]  }
  0x9a   : > { %541 = vmatpush1.bf16.msra.mxu0 %v1196_v3  ;;  %1082 = vmatpush3.bf16.msra.mxu1 %v1197_v4  ;;  %v1202_v8 = vld [vmem:[%s1697_s10 + $0x34] ss:$12 sps:$4 sm:$0xff]   ;;  %v1204_v9 = vld [vmem:[%s1697_s10 + $0x30] ss:$12 sps:$4 sm:$0xff]   ;;  %v1206_v11 = vld [vmem:[%s1697_s10 + $0x4c] ss:$12 sps:$4 sm:$0xff]  }
  0x9b   : > { %542 = vmatprep.subr.bf16.mxu0 %v1198_v5  ;;  %1083 = vmatprep.subr.bf16.mxu1 %v1436_v0  ;;  %v1208_v12 = vld [vmem:[%s1697_s10 + $0x48] ss:$12 sps:$4 sm:$0xff]   ;;  %v1209_v13 = vld [vmem:[%s1697_s10 + $0x50] ss:$12 sps:$4 sm:$0xff]   ;;  %v1212_v15 = vld [vmem:[%s1697_s10 + $0x60] ss:$12 sps:$4 sm:$0xff]  }
  0x9c   : > { %v1210_v14 = vld [vmem:[%s1697_s10 + $0x64] ss:$12 sps:$4 sm:$0xff]   ;;  %v1213_v16 = vld [vmem:[%s1697_s10 + $0x68] ss:$12 sps:$4 sm:$0xff]   ;;  %v1217_v19 = vld [vmem:[%s1697_s10 + $0x80] ss:$12 sps:$4 sm:$0xff]  }
  0x9d   : > { %v1214_v17 = vld [vmem:[%s1697_s10 + $0x7c] ss:$12 sps:$4 sm:$0xff]   ;;  %v1216_v18 = vld [vmem:[%s1697_s10 + $0x78] ss:$12 sps:$4 sm:$0xff]   ;;  %v1218_v20 = vld [vmem:[%s1697_s10 + $0x94] ss:$12 sps:$4 sm:$0xff]  }
  0x9e   : > { %543 = vmatpush1.bf16.msra.mxu0 %v1200_v6  ;;  %1084 = vmatpush3.bf16.msra.mxu1 %v1201_v7  ;;  %v1220_v21 = vld [vmem:[%s1697_s10 + $0x90] ss:$12 sps:$4 sm:$0xff]   ;;  %v1221_v22 = vld [vmem:[%s1697_s10 + $0x98] ss:$12 sps:$4 sm:$0xff]   ;;  %v1224_v24 = vld [vmem:[%s1697_s10 + $0xa8] ss:$12 sps:$4 sm:$0xff]  }
  0x9f   : > { %544 = vmatprep.subr.bf16.mxu0 %v1202_v8  ;;  %1085 = vmatprep.subr.bf16.mxu1 %v1436_v0  ;;  %v1222_v23 = vld [vmem:[%s1697_s10 + $0xac] ss:$12 sps:$4 sm:$0xff]   ;;  %v377_v25 = vld [vmem:[#allocation2] sm:$0xff]  ;;  %p371_p4 = scmp.lt.s32.totalorder %s1563_s16, 1  ;;  %v627_v30 = vshrl.u32 %v626_v29, 7  ;;  %vm736_vm3 = vcmask 130048  }
  0xa0   : > { %v378_v26 = vld [vmem:[#allocation2 + $0x8] sm:$0xff]  ;;  %v655_v33 = vld [vmem:[%s1704_s28] sm:$0x7]  ;;  %s1115_s30 = smul.u32 48, %s1694_s25  ;;  %s874_s8 = scalar_lea.sflag [#allocation4], %s1694_s25 }
  0xa1   : > { %v1225_v27 = vld [vmem:[%s1697_s10 + $0xb0] ss:$12 sps:$4 sm:$0xff]   ;;  %v379_v28 = vpack.c.bf16 %v378_v26, %v377_v25  ;;  %s372_s19 = scalar_select %p371_p4, %s1563_s16, 1  ;;  %v1757_v31 = vsub.s32 0, %v627_v30  ;;  %v1760_v34 = vsub.s32 1, %v627_v30  ;;  %v1762_v35 = vsub.s32 2, %v627_v30 }
  0xa2   : > { %545 = vmatpush1.bf16.msra.mxu0 %v1204_v9  ;;  %1086 = vmatpush3.bf16.msra.mxu1 %v1205_v10  ;;  %s370_s29 = scalar_lea.vmem [#allocation10], %s1115_s30  ;;  %s1065_s23 = smul.u32 384, %s1563_s16 }
  0xa3   : > { %546 = vmatprep.subr.bf16.mxu0 %v1206_v11  ;;  %1087 = vmatprep.subr.bf16.mxu1 %v1436_v0  ;;  %s1116_s27 = smul.u32 3, %s372_s19  ;;  %v660_v37 = vrot.slane %v655_v33, %v1757_v31  ;;  %v664_v39 = vrot.slane %v655_v33, %v1760_v34  ;;  %v668_v40 = vrot.slane %v655_v33, %v1762_v35  ;;  %s887_s7 = sshll.u32 %s370_s29, 4  ;;  %s1786_s7 = int_to_ptr.vmem [resolvable:$true] %s887_s7 }
  0xa4   : > { %s1791_s14 = scalar_lea.hbm %s1841_s6, %s1065_s23  ;;  %s1352_s10 = scalar_lea.vmem %s1786_s7, 768 }
  0xa5   : > { %s374_s26 = scalar_lea.vmem %s1837_s2, %s1116_s27  ;;  %p1353_p9 = scmp.ne.s32.totalorder %s1786_s7, %s1352_s10 }
  0xa6   : > { %547 = vmatpush1.bf16.msra.mxu0 %v1208_v12  ;;  %1088 = vmatpush3.bf16.msra.mxu1 %v1209_v13  ;;  %v624_v32 = vld [vmem:[%s374_s26] sm:$0x7]  ;;  %p1880_p12 = scmp.ne.s32.totalorder %s1866_s12, 0  ;;  %s1439_s20 = smov [#allocation10]  }
  0xa7   : > { %548 = vmatprep.subr.bf16.mxu0 %v1210_v14  ;;  %1089 = vmatprep.subr.bf16.mxu1 %v1436_v0  ;;  %v629_v36 = vrot.slane %v624_v32, %v1757_v31  ;;  %v633_v38 = vrot.slane %v624_v32, %v1760_v34  ;;  %v637_v41 = vrot.slane %v624_v32, %v1762_v35  ;;  %v1067_v14 = vld [vmem:[%s1840_s5] sm:$0xff]   ;;  %s1356_s28 = sshll.u32 %s1439_s20, 4  ;;  %s1357_s28 = int_to_ptr.vmem [resolvable:$false] %s1356_s28 }
  0xa8   : > { %p1354_p3 = pnand %p1353_p9, %p1880_p12  ;;  %s1358_s11 = scalar_lea.vmem %s1357_s28, 1536 }
  0xa9   : > { %p1359_p8 = scmp.lt.s32.totalorder %s1786_s7, %s1357_s28  ;;  %p1360_p5 = scmp.lt.s32.totalorder %s1358_s11, %s1352_s10 }
  0xaa   : > { %549 = vmatpush1.bf16.msra.mxu0 %v1212_v15  ;;  %1090 = vmatpush3.bf16.msra.mxu1 %v1213_v16  ;;  %p1355_p1 = pneg %p1354_p3 }
  0xab   : > { %550 = vmatprep.subr.bf16.mxu0 %v1214_v17  ;;  %1091 = vmatprep.subr.bf16.mxu1 %v1436_v0  ;;  %p1361_p11 = por %p1360_p5, %p1359_p8 }
  0xad   : > { %p1362_p2 = pnand %p1361_p11, %p1355_p1 }
  0xae   : > { %551 = vmatpush1.bf16.msra.mxu0 %v1216_v18  ;;  %1092 = vmatpush3.bf16.msra.mxu1 %v1217_v19  ;;  %v1068_v18 = vunpack.c.l.bf16 %v1067_v14 }
  0xaf   : > { %552 = vmatprep.subr.bf16.mxu0 %v1218_v20  ;;  %1093 = vmatprep.subr.bf16.mxu1 %v1436_v0 }
  0xb2   : > { %553 = vmatpush1.bf16.msra.mxu0 %v1220_v21  ;;  %1094 = vmatpush3.bf16.msra.mxu1 %v1221_v22  ;;  %v1069_v21 = vunpack.c.h.bf16 %v1067_v14 }
  0xb3   : > { %554 = vmatprep.subr.bf16.mxu0 %v1222_v23  ;;  %1095 = vmatprep.subr.bf16.mxu1 %v1436_v0 }
  0xb6   : > { %555 = vmatpush1.bf16.msra.mxu0 %v1224_v24  ;;  %1096 = vmatpush3.bf16.msra.mxu1 %v1225_v27 }
  0xb7   : > { %1101 = vmatprep.subr.bf16.mxu1 %v1436_v0 }
  0xb9   : > { %573 = vmatmul.mubr.bf16.vlgmr.msra.gmra.mrb[0].mxu0 %v379_v28  ;;  %1098 = vmatmul.mubr.bf16.vlgmr.msra.gmra.mrb[0].mxu1 %v379_v28 }
  0xba   : > { %815 = vmatprep.mubr.bf16.mxu0 %v1437_v1  ;;  %1103 = vmatprep.mubr.msk.bf16.mxu1 %vm1438_vm0, %v1436_v0 }
 0x18c   : > { %v574_v42 = vpop.f32.mrb[0].mxu0  ;;  %v617_v45 = vpop.f32.mrb[0].mxu1 }
 0x18d   : > { %v641_v43 = vmul.f32 %v629_v36, %v574_v42  ;;  %v672_v44 = vmul.f32 %v660_v37, %v574_v42  ;;  %v576_v46 = vpop.f32.mrb[1].mxu0  ;;  %v1099_v49 = vpop.f32.mrb[1].mxu1  ;;  %v674_v51 = vmul.f32 %v668_v40, %v617_v45  ;;  %v643_v57 = vmul.f32 %v637_v41, %v617_v45 }
 0x18e   : > { %v642_v47 = vmul.f32 %v633_v38, %v576_v46  ;;  %v673_v48 = vmul.f32 %v664_v39, %v576_v46  ;;  %v578_v50 = vpop.f32.mrb[2].mxu0  ;;  %v620_v55 = vpop.f32.mrb[2].mxu1 }
 0x18f   : > { %v644_v52 = vmul.f32 %v629_v36, %v578_v50  ;;  %v675_v53 = vmul.f32 %v660_v37, %v578_v50  ;;  %v760_v54 = vpack.c.bf16 %v578_v50, %v574_v42  ;;  %v580_v56 = vpop.f32.mrb[3].mxu0  ;;  %v762_v58 = vpack.c.bf16 %v620_v55, %v617_v45  ;;  %v1100_v62 = vpop.f32.mrb[3].mxu1 }
 0x190   : > { %v645_v59 = vmul.f32 %v633_v38, %v580_v56  ;;  %v676_v60 = vmul.f32 %v664_v39, %v580_v56  ;;  %v761_v61 = vpack.c.bf16 %v580_v56, %v576_v46  ;;  %v678_v63 = vadd.f32 %v673_v48, %v672_v44  ;;  %v763_v48 = vld [vmem:[%s1707_s18] sm:$0x7] }
 0x191   : > { %v647_v0 = vadd.f32 %v642_v47, %v641_v43  ;;  %v677_v1 = vmul.f32 %v668_v40, %v620_v55  ;;  %1102 = vmatpush3.bf16.msra.mxu1 %v762_v58  ;;  %v646_v3 = vmul.f32 %v637_v41, %v620_v55  ;;  %v768_v49 = vrot.slane %v763_v48, %v1757_v31 }
 0x192   : > { %783 = vmatprep.subr.bf16.mxu0 %v761_v61  ;;  %v682_v2 = vadd.f32 %v676_v60, %v675_v53  ;;  %v651_v4 = vadd.f32 %v645_v59, %v644_v52  ;;  %v679_v5 = vadd.f32 %v678_v63, %v674_v51  ;;  %v776_v50 = vrot.slane %v763_v48, %v1762_v35 }
 0x193   : > { %784 = vmatpush1.bf16.msra.mxu0 %v760_v54  ;;  %v648_v6 = vadd.f32 %v647_v0, %v643_v57  ;;  %v772_v51 = vrot.slane %v763_v48, %v1760_v34 }
 0x194   : > { %v683_v7 = vadd.f32 %v682_v2, %v677_v1  ;;  %v652_v8 = vadd.f32 %v651_v4, %v646_v3  ;;  %680 = vadd.xlane.f32.xlu1 %v679_v5 }
 0x195   : > { %649 = vadd.xlane.f32.xlu0 %v648_v6 }
 0x198   : > { %684 = vadd.xlane.f32.xlu1 %v683_v7 }
 0x199   : > { %653 = vadd.xlane.f32.xlu0 %v652_v8 }
 0x221   : > { %v681_v11 = vpop.xlane.xlu1 %680 }
 0x222   : > { %v650_v9 = vpop.xlane.xlu0 %649 }
 0x223   : > { %686 = vxpose.xlu0.b32.start [1/2] (short) (narrow) %v650_v9, 8 }
 0x225   : > { %v685_v15 = vpop.xlane.xlu1 %684 }
 0x226   : > { %v654_v10 = vpop.xlane.xlu0 %653 }
 0x227   : > { %687 = vxpose.xlu0.b32.end [2/2] (short) (narrow) %v654_v10, 8 }
 0x2a3   : > { %v702_v12 = vpop.trf.xlu0 }
 0x2a4   : > { %v721_v13 = vrot.slane %v702_v12, %v1757_v31 }
 0x2a6   : > { %v722_v16 = vadd.f32 %v721_v13, %v681_v11  ;;  %v723_v17 = vadd.f32 %v721_v13, %v685_v15 }
 0x2a8   : > { %v726_v19 = vmul.f32 0.2, %v722_v16  ;;  %v727_v20 = vmul.f32 0.2, %v723_v17  ;;  %vm724_vm1 = vcmp.ge.f32.partialorder %v722_v16, 0.0  ;;  %vm725_vm2 = vcmp.ge.f32.partialorder %v723_v17, 0.0 }
 0x2aa   : > { %v728_v22 = vsel %vm724_vm1, %v722_v16, %v726_v19  ;;  %v729_v23 = vsel %vm725_vm2, %v723_v17, %v727_v20 }
 0x2ab   : > { %v734_v24 = vadd.f32 %v1068_v18, %v728_v22  ;;  %v735_v26 = vadd.f32 %v1069_v21, %v729_v23 }
 0x2ad   : > { %v737_v25 = vsel %vm736_vm3, %v734_v24, -inf  ;;  %v740_v27 = vsel %vm736_vm3, %v735_v26, -inf }
 0x2ae   : > { %738 = vmax.xlane.f32.xlu1 %v737_v25 }
 0x2b2   : > { %741 = vmax.xlane.f32.xlu1 %v740_v27 }
 0x33b   : > { %v739_v28 = vpop.xlane.xlu1 %738 }
 0x33c   : > { %v743_v29 = vsub.f32 %v734_v24, %v739_v28 }
 0x33e   : > { %v745_v30 = vmul.f32 1.442695, %v743_v29 }
 0x33f   : > { %v742_v32 = vpop.xlane.xlu1 %741 }
 0x340   : > { %1226 = vpow2.f32 %v745_v30  ;;  %v744_v33 = vsub.f32 %v735_v26, %v742_v32 }
 0x342   : > { %v747_v36 = vmul.f32 1.442695, %v744_v33 }
 0x344   : > { %1228 = vpow2.f32 %v747_v36 }
 0x34a   : > { %v1227_v37 = vpop.eup %1226 }
 0x34b   : > { %v749_v38 = vsel %vm736_vm3, %v1227_v37, 0.0 }
 0x34c   : > { %750 = vadd.xlane.f32.xlu1 %v749_v38 }
 0x34e   : > { %v1229_v39 = vpop.eup %1228 }
 0x34f   : > { %v752_v40 = vsel %vm736_vm3, %v1229_v39, 0.0 }
 0x350   : > { %753 = vadd.xlane.f32.xlu1 %v752_v40 }
 0x3d9   : > { %v751_v41 = vpop.xlane.xlu1 %750 }
 0x3da   : > { %1230 = vrcp.f32 %v751_v41 }
 0x3dd   : > { %v754_v42 = vpop.xlane.xlu1 %753 }
 0x3de   : > { %1232 = vrcp.f32 %v754_v42 }
 0x3e4   : > { %v1231_v43 = vpop.eup %1230 }
 0x3e5   : > { %v757_v45 = vmul.f32 %v1231_v43, %v1227_v37 }
 0x3e8   : > { %v1233_v44 = vpop.eup %1232 }
 0x3e9   : > { %v758_v46 = vmul.f32 %v1233_v44, %v1229_v39 }
 0x3eb   : > { %v759_v47 = vpack.c.bf16 %v758_v46, %v757_v45 }
 0x3ed   : > { %1060 = vmatmul.mubr.msk.bf16.vlgmr.msra.gmra.mrb[4].mxu0 %vm736_vm3, %v759_v47  ;;  %1104 = vmatmul.mubr.msk.bf16.vlgmr.msra.gmra.mrb[4].mxu1 %vm736_vm3, %v759_v47 }
 0x4c0   : > { %v817_v52 = vpop.f32.mrb[4].mxu0  ;;  %v860_v53 = vpop.f32.mrb[4].mxu1 }
 0x4c1   : > { %v818_v54 = vadd.f32 %v817_v52, %v768_v49  ;;  %v861_v55 = vadd.f32 %v860_v53, %v776_v50  ;;  %v819_v56 = vpop.f32.mrb[5].mxu0  ;;  %v1105_v57 = vpop.f32.mrb[5].mxu1 }
 0x4c2   : > { %v820_v58 = vadd.f32 %v819_v56, %v772_v51  ;;  %v821_v59 = vpop.f32.mrb[6].mxu0  ;;  %v863_v31 = vpop.f32.mrb[6].mxu1 }
 0x4c3   : > { %867 = vst [vmem:[%s370_s29] sm:$0xff] %v818_v54  ;;  %869 = vst [vmem:[%s370_s29 + $0x10] sm:$0xff] %v861_v55  ;;  %v822_v34 = vadd.f32 %v821_v59, %v768_v49  ;;  %v864_v35 = vadd.f32 %v863_v31, %v776_v50  ;;  %v823_v60 = vpop.f32.mrb[7].mxu0  ;;  %v1106_v61 = vpop.f32.mrb[7].mxu1 }
 0x4c4   : > { %868 = vst [vmem:[%s370_s29 + $0x8] sm:$0xff] %v820_v58  ;;  %v824_v62 = vadd.f32 %v823_v60, %v772_v51 }
 0x4c5   : > { %870 = vst [vmem:[%s370_s29 + $0x18] sm:$0xff] %v822_v34  ;;  %872 = vst [vmem:[%s370_s29 + $0x28] sm:$0xff] %v864_v35 }
 0x4c6   : > { %871 = vst [vmem:[%s370_s29 + $0x20] sm:$0xff] %v824_v62 }
 0x4c7   : > { %1365 = shalt.err (!%p1362_p2)
}
 0x4c8   : > { %s1366_s18 = scalar_lea.hbm %s1791_s14, 768  ;;  %s1370_s15 = scalar_lea.hbm %s1841_s6, 1536 }
 0x4c9   : > { %p1367_p13 = scmp.ne.s32.totalorder %s1791_s14, %s1366_s18  ;;  %p1371_p7 = scmp.lt.u32.totalorder %s1791_s14, %s1841_s6 }
 0x4ca   : > { %p1372_p6 = scmp.lt.u32.totalorder %s1370_s15, %s1366_s18  ;;  %p1374_p9 = scmp.lt.u32.totalorder %s1366_s18, %s1791_s14 }
 0x4cb   : > { %p1368_p0 = pnand %p1367_p13, %p1880_p12 }
 0x4cc   : > { %p1373_p4 = por %p1372_p6, %p1371_p7 }
 0x4cd   : > { %p1369_p10 = pneg %p1368_p0 }
 0x4ce   : > { %p1375_p3 = por %p1374_p9, %p1373_p4 }
 0x4d0   : > { %p1376_p1 = pnand %p1375_p3, %p1369_p10 }
 0x4d2   : > { %1379 = shalt.err (!%p1376_p1)
}
 0x4d3   : > { %s1440_s9 = smov 384   ;;  %s1441_s1 = smov 768  }
 0x4d4   : > { %s1442_s30 = smov 24  }
 0x4d5   : > { %1127 = dma.vmem_to_hbm [thread:$0]  (%p1880_p12), %s1786_s7, 768, %s1791_s14, %s874_s8, %s1440_s9, %s1441_s1, %s1442_s30  }
 0x4d6 PF: > { %s1881_s29 = sld [smem:[#allocation18_spill]]  ;;  %s902_s23 = sand.u32 1, %s1414_s21  }
 0x4d7   : > { %p1883_p5 = scmp.ge.s32.totalorder %s1426_s24, 2  ;;  %s903_s16 = scalar_lea.sflag [#allocation4], %s902_s23 }
 0x4dc   : > { %p1882_p8 = scmp.ne.s32.totalorder %s1881_s29, 0 }
 0x4de   : > { %p1144_p11 = pnand %p1883_p5, %p1882_p8 }
 0x4e0   : > { %1409 = dma.done.wait (!%p1144_p11), %s903_s16, 768  }
 0x4e1   : > { %1411 = vsyncadd (!%p1144_p11), %s903_s16, 4294966528  ;;  %s1884_s24 = sld [smem:[#allocation16_spill]]  ;;  %s1885_s17 = sld [smem:[#allocation15_spill]] }
 0x4e2   : > { %s1886_s23 = sld [smem:[#allocation17_spill]]  ;;  %s1887_s21 = smov %s1418_s22 }
 0x4e7   : > { %p23_p2 = scmp.ge.s32.totalorder %s1884_s24, 4   ;;  %s1888_s22 = smov %s1885_s17 }
 0x4e9   :  { %25 = sbr.rel (!%p23_p2) target bundleno = 10 (0xa), region = 121 }
 0x4f0   :  { %908 = vsyncpa [#allocation3], 1 }
 0x4f1   :  { %910 = vsyncpa [#allocation3 + $0x1], 1 }
 0x4f2   :  { %911 = vsyncpa [#allocation6], 1 }
 0x4f3   :  { %913 = vsyncpa [#allocation6 + $0x1], 1 }
 0x4f4   :  { %914 = vsyncpa [#allocation9], 1 }
 0x4f5   :  { %916 = vsyncpa [#allocation9 + $0x1], 1 }
 0x4f6   :  { %917 = vsyncpa [#allocation4], 1 }
 0x4f7   :  { %919 = vsyncpa [#allocation4 + $0x1], 1 }

</bundles_post_ra>
